<compile_context>
chip_gen: v6e
topology: v6e:2x2x1
jax: 0.10.0
libtpu: 0.0.40
codegen_flags: <defaults>
</compile_context>

<pallas_src>
import functools

import jax
import jax.numpy as jnp
from jax import lax
from jax.experimental import pallas as pl
from jax.experimental.pallas import tpu as pltpu


def _round_up(x, m):
    return (x + m - 1) // m * m


def _eqv_ln_kernel(x_ref, p_ref, o_ref, *, eps):
    # x_ref: [tn, SCp] flattened lane-dense slab (SCp = padded S*C).
    # p_ref: [8, SCp] packed per-lane parameters.
    x = x_ref[...].astype(jnp.float32)

    m0w = p_ref[0:1, :]   # gamma on L=0 lanes, 0 elsewhere
    m1w = p_ref[1:2, :]   # 0 on L=0 lanes, affine_weight[l] on L>0 lanes
    m0c = p_ref[2:3, :]   # 1/C on L=0 lanes, 0 elsewhere
    bal = p_ref[3:4, :]   # 1/((2l+1)*lmax*C) on L>0 lanes, 0 elsewhere
    b   = p_ref[4:5, :]   # beta on L=0 lanes, 0 elsewhere

    xsq = x * x

    # L = 0: LayerNorm statistics over the first C lanes (single-pass form).
    mu  = jnp.sum(x * m0c, axis=-1, keepdims=True)     # [tn, 1] mean
    ex2 = jnp.sum(xsq * m0c, axis=-1, keepdims=True)   # [tn, 1] E[x^2]
    var = ex2 - mu * mu
    inv0 = lax.rsqrt(var + eps)

    # L > 0: degree-balanced component norm (bal already folds 1/C and 1/lmax).
    fn = jnp.sum(xsq * bal, axis=-1, keepdims=True)    # [tn, 1]
    inv1 = lax.rsqrt(fn + eps)

    # Single fused affine: out = x*scale + offset.
    scale = inv0 * m0w + inv1 * m1w                    # [tn, SCp]
    offset = b - (mu * inv0) * m0w                     # [tn, SCp]
    o_ref[...] = (x * scale + offset).astype(o_ref.dtype)


def equivariant_layernorm(x, gamma, beta, affine_weight, *, lmax, eps=1e-5,
                          tn=None, vmem_budget_bytes=24 << 20):
    """x: [N, S, C], S = (lmax+1)^2.
    gamma/beta: [C] LayerNorm params for L=0.
    affine_weight: [lmax, C] per-degree scale for L>0."""
    N, S, C = x.shape
    assert S == (lmax + 1) ** 2
    SC = S * C
    SCp = _round_up(SC, 128)          # keep the output store lane-dense

    # ---- N-tile sizing ----------------------------------------------------
    # Honest VMEM accounting: double-buffered in + out blocks (~4x block) plus
    # the full-width f32 temporaries the body keeps live (~3x more) => ~7x.
    bytes_per_row = SCp * 4
    tn_cap = max(8, (vmem_budget_bytes // (7 * bytes_per_row)) // 8 * 8)
    if tn is None:
        tn = tn_cap                   # default: as big as the budget allows
    tn = min(_round_up(tn, 8), tn_cap, _round_up(N, 8))
    # Keep >= 2 grid steps when there is enough work so both v7x TensorCores
    # get a share of the "parallel" N axis.
    if N > 8:
        tn = min(tn, _round_up(-(-N // 2), 8))
    tn = max(tn, 8)

    # ---- Precomputed per-lane parameter slab [8, SCp] ----------------------
    m0w_rows = [gamma.astype(jnp.float32)]
    m1w_rows = [jnp.zeros((C,), jnp.float32)]
    m0c_rows = [jnp.full((C,), 1.0 / C, jnp.float32)]
    bal_rows = [jnp.zeros((C,), jnp.float32)]
    b_rows = [beta.astype(jnp.float32)]
    for l in range(1, lmax + 1):
        length = 2 * l + 1
        m0w_rows.append(jnp.zeros((length * C,), jnp.float32))
        m1w_rows.append(jnp.tile(affine_weight[l - 1].astype(jnp.float32), (length,)))
        m0c_rows.append(jnp.zeros((length * C,), jnp.float32))
        bal_rows.append(jnp.full((length * C,), 1.0 / (length * lmax * C), jnp.float32))
        b_rows.append(jnp.zeros((length * C,), jnp.float32))

    def _row(pieces):
        row = jnp.concatenate(pieces)
        if SCp != SC:
            row = jnp.pad(row, (0, SCp - SC))
        return row

    zero_row = jnp.zeros((SCp,), jnp.float32)
    params = jnp.stack([
        _row(m0w_rows), _row(m1w_rows), _row(m0c_rows), _row(bal_rows),
        _row(b_rows), zero_row, zero_row, zero_row,
    ])                                                      # [8, SCp]

    x_flat = x.reshape(N, SC)
    if SCp != SC:
        x_flat = jnp.pad(x_flat, ((0, 0), (0, SCp - SC)))

    block_bytes = tn * bytes_per_row

    kernel = functools.partial(_eqv_ln_kernel, eps=eps)
    cost = pl.CostEstimate(
        flops=10 * N * SCp,
        transcendentals=2 * N,
        bytes_accessed=2 * N * bytes_per_row + 8 * SCp * 4,
    )

    out_flat = pl.pallas_call(
        kernel,
        out_shape=jax.ShapeDtypeStruct((N, SCp), x.dtype),
        grid_spec=pltpu.PrefetchScalarGridSpec(
            num_scalar_prefetch=0,
            grid=(pl.cdiv(N, tn),),
            in_specs=[
                pl.BlockSpec((tn, SCp), lambda i: (i, 0)),
                pl.BlockSpec((8, SCp), lambda i: (0, 0)),
            ],
            out_specs=pl.BlockSpec((tn, SCp), lambda i: (i, 0)),
        ),
        compiler_params=pltpu.CompilerParams(
            dimension_semantics=("parallel",),
            # 7x covers double-buffered I/O blocks + in-kernel temporaries;
            # stays well under v7x's 64 MiB physical VMEM with the default
            # 24 MiB budget, and raises v5e/v6e scoped defaults when needed.
            vmem_limit_bytes=int(max(7 * block_bytes + (2 << 20), 16 << 20)),
        ),
        cost_estimate=cost,
    )(x_flat, params)

    if SCp != SC:
        out_flat = out_flat[:, :SC]
    return out_flat.reshape(N, S, C)


def reference(x, gamma, beta, affine_weight, *, lmax, eps=1e-5):
    """Pure-JAX port of the PyTorch forward (component + std_balance_degrees)."""
    N, S, C = x.shape
    l0 = x[:, 0:1, :]
    mu = jnp.mean(l0, axis=-1, keepdims=True)
    var = jnp.mean((l0 - mu) ** 2, axis=-1, keepdims=True)
    l0n = (l0 - mu) / jnp.sqrt(var + eps) * gamma.reshape(1, 1, C) + beta.reshape(1, 1, C)
    out = [l0n]

    feat = x[:, 1:, :]
    bal = jnp.zeros((S - 1, 1), jnp.float32)
    for l in range(1, lmax + 1):
        start, length = l * l - 1, 2 * l + 1
        bal = bal.at[start:start + length, :].set(1.0 / length)
    bal = bal / lmax
    fn = jnp.einsum('nic,ia->nac', feat ** 2, bal)          # [N,1,C]
    fn = jnp.mean(fn, axis=2, keepdims=True)                # [N,1,1]
    fn = (fn + eps) ** -0.5
    for l in range(1, lmax + 1):
        start, length = l * l, 2 * l + 1
        f = x[:, start:start + length, :]
        ww = affine_weight[l - 1].reshape(1, 1, C)
        out.append(f * (fn * ww))
    return jnp.concatenate(out, axis=1)


if __name__ == "__main__":
    lmax = 3
    num_channels = 32
    N = 16
    S = (lmax + 1) ** 2
    eps = 1e-5

    key = jax.random.PRNGKey(0)
    k1, k2, k3, k4 = jax.random.split(key, 4)
    x = jax.random.normal(k1, (N, S, num_channels), dtype=jnp.float32)
    # Deterministic parameter init (synthetic; mimics nn.LayerNorm/affine params).
    gamma = 1.0 + 0.1 * jax.random.normal(k2, (num_channels,), dtype=jnp.float32)
    beta = 0.1 * jax.random.normal(k3, (num_channels,), dtype=jnp.float32)
    affine_weight = 1.0 + 0.1 * jax.random.normal(k4, (lmax, num_channels), dtype=jnp.float32)

    out = equivariant_layernorm(x, gamma, beta, affine_weight, lmax=lmax, eps=eps)
    out = jax.block_until_ready(out)

    ref = reference(x, gamma, beta, affine_weight, lmax=lmax, eps=eps)
    assert out.shape == (N, S, num_channels)
    assert jnp.allclose(out, ref, rtol=1e-5, atol=1e-5), float(jnp.max(jnp.abs(out - ref)))
    print("KERNEL_OK")
</pallas_src>

<mosaic_0001>
module attributes {stable_mosaic.version = 11 : i64} {
  func.func @_eqv_ln_kernel(%arg0: i32, %arg1: memref<8x512xf32, #tpu.memory_space<vmem>>, %arg2: memref<8x512xf32, #tpu.memory_space<vmem>>, %arg3: memref<8x512xf32, #tpu.memory_space<vmem>>) attributes {dimension_semantics = [#tpu.dimension_semantics<parallel>], iteration_bounds = array<i64: 2>, scalar_prefetch = 0 : i64, scratch_operands = 0 : i64, tpu.core_type = #tpu.core_type<tc>, window_params = [{transform_indices = @transform_0, window_bounds = array<i64: 8, 512>}, {pipeline_mode = #tpu.pipeline_mode<synchronous>, transform_indices = @transform_1, window_bounds = array<i64: 8, 512>}, {transform_indices = @transform_2, window_bounds = array<i64: 8, 512>}]} {
    %c0 = arith.constant 0 : index
    %c0_0 = arith.constant 0 : index
    %0 = vector.load %arg1[%c0, %c0_0] : memref<8x512xf32, #tpu.memory_space<vmem>>, vector<8x512xf32>
    %c0_1 = arith.constant 0 : index
    %c0_2 = arith.constant 0 : index
    %1 = vector.load %arg2[%c0_1, %c0_2] : memref<8x512xf32, #tpu.memory_space<vmem>>, vector<1x512xf32>
    %c1 = arith.constant 1 : index
    %c0_3 = arith.constant 0 : index
    %2 = vector.load %arg2[%c1, %c0_3] : memref<8x512xf32, #tpu.memory_space<vmem>>, vector<1x512xf32>
    %c2 = arith.constant 2 : index
    %c0_4 = arith.constant 0 : index
    %3 = vector.load %arg2[%c2, %c0_4] : memref<8x512xf32, #tpu.memory_space<vmem>>, vector<1x512xf32>
    %c3 = arith.constant 3 : index
    %c0_5 = arith.constant 0 : index
    %4 = vector.load %arg2[%c3, %c0_5] : memref<8x512xf32, #tpu.memory_space<vmem>>, vector<1x512xf32>
    %c4 = arith.constant 4 : index
    %c0_6 = arith.constant 0 : index
    %5 = vector.load %arg2[%c4, %c0_6] : memref<8x512xf32, #tpu.memory_space<vmem>>, vector<1x512xf32>
    %6 = arith.mulf %0, %0 : vector<8x512xf32>
    %7 = vector.broadcast %3 : vector<1x512xf32> to vector<8x512xf32>
    %8 = arith.mulf %0, %7 : vector<8x512xf32>
    %cst = arith.constant dense<0.000000e+00> : vector<8xf32>
    %9 = vector.multi_reduction <add>, %8, %cst [1] : vector<8x512xf32> to vector<8xf32>
    %10 = vector.shape_cast %9 : vector<8xf32> to vector<8x1xf32>
    %11 = vector.broadcast %3 : vector<1x512xf32> to vector<8x512xf32>
    %12 = arith.mulf %6, %11 : vector<8x512xf32>
    %cst_7 = arith.constant dense<0.000000e+00> : vector<8xf32>
    %13 = vector.multi_reduction <add>, %12, %cst_7 [1] : vector<8x512xf32> to vector<8xf32>
    %14 = vector.shape_cast %13 : vector<8xf32> to vector<8x1xf32>
    %15 = arith.mulf %10, %10 : vector<8x1xf32>
    %16 = arith.subf %14, %15 : vector<8x1xf32>
    %cst_8 = arith.constant 9.99999974E-6 : f32
    %17 = vector.broadcast %cst_8 : f32 to vector<8x1xf32>
    %18 = arith.addf %16, %17 : vector<8x1xf32>
    %19 = math.rsqrt %18 : vector<8x1xf32>
    %20 = vector.broadcast %4 : vector<1x512xf32> to vector<8x512xf32>
    %21 = arith.mulf %6, %20 : vector<8x512xf32>
    %cst_9 = arith.constant dense<0.000000e+00> : vector<8xf32>
    %22 = vector.multi_reduction <add>, %21, %cst_9 [1] : vector<8x512xf32> to vector<8xf32>
    %23 = vector.shape_cast %22 : vector<8xf32> to vector<8x1xf32>
    %cst_10 = arith.constant 9.99999974E-6 : f32
    %24 = vector.broadcast %cst_10 : f32 to vector<8x1xf32>
    %25 = arith.addf %23, %24 : vector<8x1xf32>
    %26 = math.rsqrt %25 : vector<8x1xf32>
    %27 = vector.broadcast %19 : vector<8x1xf32> to vector<8x512xf32>
    %28 = vector.broadcast %1 : vector<1x512xf32> to vector<8x512xf32>
    %29 = arith.mulf %27, %28 : vector<8x512xf32>
    %30 = vector.broadcast %26 : vector<8x1xf32> to vector<8x512xf32>
    %31 = vector.broadcast %2 : vector<1x512xf32> to vector<8x512xf32>
    %32 = arith.mulf %30, %31 : vector<8x512xf32>
    %33 = arith.addf %29, %32 : vector<8x512xf32>
    %34 = arith.mulf %10, %19 : vector<8x1xf32>
    %35 = vector.broadcast %34 : vector<8x1xf32> to vector<8x512xf32>
    %36 = vector.broadcast %1 : vector<1x512xf32> to vector<8x512xf32>
    %37 = arith.mulf %35, %36 : vector<8x512xf32>
    %38 = vector.broadcast %5 : vector<1x512xf32> to vector<8x512xf32>
    %39 = arith.subf %38, %37 : vector<8x512xf32>
    %40 = arith.mulf %0, %33 : vector<8x512xf32>
    %41 = arith.addf %40, %39 : vector<8x512xf32>
    %c0_11 = arith.constant 0 : index
    %c0_12 = arith.constant 0 : index
    %42 = vector.load %arg3[%c0_11, %c0_12] : memref<8x512xf32, #tpu.memory_space<vmem>>, vector<8x512xf32>
    tpu.vector_store %arg3[%c0_11, %c0_12], %41 {strides = array<i32>} : memref<8x512xf32, #tpu.memory_space<vmem>>, vector<8x512xf32>,
    return
  }
  func.func @transform_0(%arg0: i32) -> (i32, i32) {
    %c0_i32 = arith.constant 0 : i32
    %c0_i32_0 = arith.constant 0 : i32
    return %arg0, %c0_i32 : i32, i32
  }
  func.func @transform_1(%arg0: i32) -> (i32, i32) {
    %c0_i32 = arith.constant 0 : i32
    %c0_i32_0 = arith.constant 0 : i32
    %c0_i32_1 = arith.constant 0 : i32
    return %c0_i32, %c0_i32_0 : i32, i32
  }
  func.func @transform_2(%arg0: i32) -> (i32, i32) {
    %c0_i32 = arith.constant 0 : i32
    %c0_i32_0 = arith.constant 0 : i32
    return %arg0, %c0_i32 : i32, i32
  }
}

</mosaic_0001>

<bundles_post_ra>
// kernel: tpu_custom_call.1
= control target key start
LH: loop header
LB: loop body
LE: loop exit
PB: predicated region body
PF: predicated region fallthrough
CT: control target
= control target key end

     0   :  { %7 = vsyncpa [#allocation3], 0  ;;  %s911_s0 = inlined_call_operand.hbm [shape: f32[16,512], index: 0, kind: input, shape index: {}]   ;;  %s912_s1 = inlined_call_operand.hbm [shape: f32[8,512], index: 1, kind: input, shape index: {}]   ;;  %s913_s2 = inlined_call_operand.hbm [shape: f32[16,512], index: 2, kind: output, shape index: {}]  }
   0x1   :  { %9 = vsyncpa [#allocation3 + $0x1], 0 }
   0x2   :  { %10 = vsyncpa [#allocation6], 0 }
   0x3   :  { %11 = vsyncpa [#allocation4], 0 }
   0x4   :  { %13 = vsyncpa [#allocation4 + $0x1], 0  ;;  %s677_s9 = smov 0   ;;  %s679_s10 = smov 0  }
   0x5   :  { %s681_s11 = smov 0   ;;  %s683_s12 = smov 0  }
   0x6 LB: > { %s698_s13 = sadd.s32 4294967295, %s657_s12   ;;  %s456_s14 = sadd.s32 4294967294, %s657_s12   ;;  %s657_s12 = sphi %s683_s12, %s936_s12   ;;  %s653_s11 = sphi %s681_s11, %s935_s11   ;;  %s649_s10 = sphi %s679_s10, %s934_s10   ;;  %s645_s9 = sphi %s677_s9, %s933_s9  }
   0x7   : > { %p39_p0 = scmp.ne.s32.totalorder %s649_s10, %s645_s9  ;;  %p914_p1 = scmp.eq.s32.totalorder %s698_s13, 0 }
   0x8   : > { %p90_p3 = scmp.eq.s32.totalorder %s456_s14, 1  ;;  %p457_p5 = scmp.ge.s32.totalorder %s657_s12, 1 }
   0x9   : > { %p707_p4 = por %p914_p1, %p39_p0  ;;  %p97_p7 = scmp.lt.s32.totalorder %s657_s12, 3 }
   0xa   : > { %p712_p6 = por %p90_p3, %p39_p0  ;;  %s659_s18 = smov [#allocation5]  }
   0xb   : > { %s918_s15 = scalar_select %p707_p4, 1, 0 }
   0xc   : > { %s919_s16 = scalar_select %p712_p6, 1, 0 }
   0xd   : > { %p717_p8 = pnand %p457_p5, %p97_p7  ;;  %s110_s19 = sshll.u32 %s659_s18, 4  ;;  %s111_s19 = int_to_ptr.vmem [resolvable:$true] %s110_s19 }
   0xe   : > { %s725_s20 = sadd.s32 1, %s657_s12   ;;  %s26_s24 = sadd.s32 1, %s653_s11 }
   0xf   : > { %s920_s17 = scalar_select %p717_p8, 1, 0 }
  0x10   : > { %p482_p10 = pneg %p717_p8  ;;  %s23_s22 = ssub.s32 %s657_s12, %s725_s20 }
  0x11   : > { %p735_p12 = scmp.eq.s32.totalorder %s23_s22, 0  ;;  %p33_p13 = scmp.ne.s32.totalorder %s653_s11, %s649_s10 }
  0x12   : > { %p729_p11 = pnand %p482_p10, %p914_p1  ;;  %s546_s25 = scalar_lea.vmem %s111_s19, 512 }
  0x13   : > { %p547_p3 = scmp.ne.s32.totalorder %s111_s19, %s546_s25  ;;  %p554_p9 = scmp.lt.s32.totalorder %s111_s19, %s111_s19 }
  0x14   : > { %p537_p0 = pneg %p729_p11  ;;  %p555_p2 = scmp.lt.s32.totalorder %s546_s25, %s546_s25 }
  0x16   : > { %p549_p5 = pnand %p547_p3, %p537_p0  ;;  %p556_p10 = por %p555_p2, %p554_p9 }
  0x18   : > { %p550_p7 = pneg %p549_p5 }
  0x1a   : > { %p557_p1 = pnand %p556_p10, %p550_p7 }
  0x1c   : > { %560 = shalt.err (!%p557_p1)
}
  0x1d   : > { %485 = dma.hbm_to_vmem [thread:$0]  (!%p729_p11), %s912_s1, 512, %s111_s19, [#allocation6]  }
  0x1e   : > { %s752_s28 = scalar_select %p735_p12, %s653_s11, %s26_s24  }
  0x1f   : > { %p34_p1 = scmp.eq.s32.totalorder %s657_s12, 0  ;;  %p923_p2 = scmp.eq.s32.totalorder %s698_s13, 1 }
  0x20   : > { %p495_p0 = scmp.lt.s32.totalorder %s657_s12, 2  ;;  %s121_s30 = sand.u32 1, %s653_s11  }
  0x21   : > { %p760_p9 = por %p923_p2, %p33_p13  ;;  %p35_p3 = por %p34_p1, %p33_p13 }
  0x22   : > { %s460_s3 = sshll.u32 %s121_s30, 5  ;;  %s472_s4 = sshll.u32 %s657_s12, 9 }
  0x23   : > { %s924_s29 = scalar_select %p760_p9, 1, 0 }
  0x24   : > { %s773_s7 = scalar_lea.hbm %s911_s0, %s472_s4  ;;  %s125_s8 = scalar_lea.vmem [#allocation2], %s460_s3 }
  0x25   : > { %s133_s14 = sshll.u32 %s125_s8, 4  ;;  %p775_p11 = pnand %p495_p0, %p35_p3  ;;  %s134_s14 = int_to_ptr.vmem [resolvable:$true] %s133_s14 }
  0x26   : > { %s122_s19 = scalar_lea.sflag [#allocation3], %s121_s30  ;;  %s561_s21 = scalar_lea.hbm %s773_s7, 512 }
  0x27   : > { %p562_p12 = scmp.ne.s32.totalorder %s773_s7, %s561_s21  ;;  %p563_p13 = pneg %p775_p11 }
  0x28   : > { %s566_s24 = scalar_lea.hbm %s911_s0, 1024  ;;  %p567_p10 = scmp.lt.s32.totalorder %s773_s7, %s911_s0 }
  0x29   : > { %p564_p5 = pnand %p563_p13, %p562_p12  ;;  %p568_p1 = scmp.lt.s32.totalorder %s566_s24, %s561_s21 }
  0x2b   : > { %p565_p7 = pneg %p564_p5  ;;  %p569_p2 = por %p568_p1, %p567_p10 }
  0x2d   : > { %p570_p0 = pnand %p569_p2, %p565_p7 }
  0x2f   : > { %573 = shalt.err (!%p570_p0)
}
  0x30   : > { %s574_s27 = scalar_lea.vmem %s134_s14, 512  ;;  %s660_s30 = smov [#allocation2]  }
  0x31   : > { %p575_p3 = scmp.ne.s32.totalorder %s134_s14, %s574_s27  ;;  %s579_s3 = sshll.u32 %s660_s30, 4  ;;  %s580_s3 = int_to_ptr.vmem [resolvable:$false] %s579_s3 }
  0x32   : > { %s581_s4 = scalar_lea.vmem %s580_s3, 1024  ;;  %p582_p12 = scmp.lt.s32.totalorder %s134_s14, %s580_s3 }
  0x33   : > { %p577_p6 = pnand %p575_p3, %p563_p13  ;;  %p583_p5 = scmp.lt.s32.totalorder %s581_s4, %s574_s27 }
  0x35   : > { %p578_p9 = pneg %p577_p6  ;;  %p584_p4 = por %p583_p5, %p582_p12 }
  0x37   : > { %p585_p8 = pnand %p584_p4, %p578_p9 }
  0x39   : > { %588 = shalt.err (!%p585_p8)
}
  0x3a   : > { %489 = dma.hbm_to_vmem [thread:$0]  (!%p775_p11), %s773_s7, 512, %s134_s14, %s122_s19  }
  0x3b   : > { %p926_p7 = scmp.ne.s32.totalorder %s920_s17, 0 }
  0x3c   : > { %s796_s5 = sand.u32 (!%p926_p7), 1, %s649_s10   ;;  %p927_p4 = scmp.ne.s32.totalorder (!%p926_p7), %s918_s15, 0 }
  0x3d   : > { %142 = sbr.rel (%p926_p7) target bundleno = 269 (0x10d), region = 28  ;;  %s464_s6 = sshll.u32 (!%p926_p7), %s796_s5, 5 }
  0x3e   : > { %s145_s8 = scalar_lea.sflag (!%p926_p7), [#allocation3], %s796_s5  ;;  %s148_s21 = scalar_lea.vmem (!%p926_p7), [#allocation2], %s464_s6 }
  0x42   : > { %632 = dma.done.wait (%p927_p4), %s145_s8, 512  }
  0x43   : > { %634 = vsyncadd (%p927_p4), %s145_s8, 4294966784  ;;  %p928_p6 = scmp.eq.s32.totalorder %s698_s13, 0 }
  0x45   : > { %636 = dma.done.wait (%p928_p6), [#allocation6], 512   ;;  %p929_p8 = pmov %p928_p6 }
  0x46   : > { %v191_v0 = vlaneseq  ;;  %v818_v6 = vld [vmem:[%s148_s21] sm:$0xff]  ;;  %v820_v7 = vld [vmem:[%s148_s21 + $0x8] sm:$0xff]  ;;  %v822_v8 = vld [vmem:[%s148_s21 + $0x10] sm:$0xff]  ;;  %s473_s15 = sshll.u32 %s698_s13, 9  ;;  %s172_s17 = scalar_lea.vmem [#allocation7], %s464_s6 }
  0x47   : > { %638 = vsyncadd (%p929_p8), [#allocation6], 4294966784  ;;  %v181_v9 = vld [vmem:[#allocation5 + $0x2] ss:$8 sm:$0xf]  ;;  %v186_v10 = vmul.f32 %v818_v6, %v818_v6  ;;  %v187_v11 = vmul.f32 %v820_v7, %v820_v7  ;;  %v188_v12 = vmul.f32 %v822_v8, %v822_v8  ;;  %s376_s7 = sshll.u32 %s172_s17, 4  ;;  %s868_s19 = scalar_lea.hbm %s913_s2, %s473_s15  ;;  %s870_s7 = int_to_ptr.vmem [resolvable:$true] %s376_s7 }
  0x48   : > { %v192_v1 = vshrl.u32 %v191_v0, 7  ;;  %v830_v13 = vld [vmem:[%s148_s21 + $0x18] sm:$0xff]  ;;  %s362_s13 = scalar_lea.sflag [#allocation4], %s796_s5  ;;  %s589_s22 = scalar_lea.vmem %s870_s7, 512 }
  0x49   : > { %v183_v18 = vld [vmem:[#allocation5 + $0x3] ss:$8 sm:$0xf]  ;;  %v189_v25 = vmul.f32 %v830_v13, %v830_v13  ;;  %v179_v52 = vld [vmem:[#allocation5 + $0x1] ss:$8 sm:$0xf]  ;;  %p590_p9 = scmp.ne.s32.totalorder %s870_s7, %s589_s22 }
  0x4a   : > { %v810_v2 = vsub.s32 0, %v192_v1  ;;  %v812_v3 = vsub.s32 1, %v192_v1  ;;  %v814_v4 = vsub.s32 2, %v192_v1  ;;  %v816_v5 = vsub.s32 3, %v192_v1  ;;  %p930_p11 = scmp.ne.s32.totalorder %s924_s29, 0  ;;  %s661_s23 = smov [#allocation7]  }
  0x4b   : > { %v177_v53 = vld [vmem:[#allocation5] ss:$8 sm:$0xf]  ;;  %v185_v59 = vld [vmem:[#allocation5 + $0x4] ss:$8 sm:$0xf] }
  0x4c   : > { %v194_v14 = vrot.slane %v181_v9, %v810_v2  ;;  %v198_v15 = vrot.slane %v181_v9, %v812_v3  ;;  %v202_v16 = vrot.slane %v181_v9, %v814_v4  ;;  %v206_v17 = vrot.slane %v181_v9, %v816_v5  ;;  %p591_p13 = pnand %p590_p9, %p930_p11  ;;  %s593_s24 = sshll.u32 %s661_s23, 4  ;;  %s594_s24 = int_to_ptr.vmem [resolvable:$false] %s593_s24 }
  0x4d   : > { %v237_v19 = vrot.slane %v183_v18, %v810_v2  ;;  %v241_v20 = vrot.slane %v183_v18, %v812_v3  ;;  %v245_v21 = vrot.slane %v183_v18, %v814_v4  ;;  %v249_v31 = vrot.slane %v183_v18, %v816_v5  ;;  %s595_s25 = scalar_lea.vmem %s594_s24, 1024  ;;  %p596_p1 = scmp.lt.s32.totalorder %s870_s7, %s594_s24 }
  0x4e   : > { %v211_v22 = vmul.f32 %v194_v14, %v818_v6  ;;  %v212_v23 = vmul.f32 %v198_v15, %v820_v7  ;;  %v213_v24 = vmul.f32 %v202_v16, %v822_v8  ;;  %v214_v26 = vmul.f32 %v206_v17, %v830_v13  ;;  %p592_p10 = pneg %p591_p13  ;;  %p597_p2 = scmp.lt.s32.totalorder %s595_s25, %s589_s22 }
  0x4f   : > { %v220_v27 = vmul.f32 %v194_v14, %v186_v10  ;;  %v221_v28 = vmul.f32 %v198_v15, %v187_v11  ;;  %v222_v29 = vmul.f32 %v202_v16, %v188_v12  ;;  %v254_v32 = vmul.f32 %v237_v19, %v186_v10 }
  0x50   : > { %v215_v30 = vadd.f32 %v212_v23, %v211_v22  ;;  %v255_v33 = vmul.f32 %v241_v20, %v187_v11  ;;  %v256_v35 = vmul.f32 %v245_v21, %v188_v12  ;;  %v223_v37 = vmul.f32 %v206_v17, %v189_v25  ;;  %p598_p0 = por %p597_p2, %p596_p1 }
  0x51   : > { %v224_v34 = vadd.f32 %v221_v28, %v220_v27  ;;  %v257_v38 = vmul.f32 %v249_v31, %v189_v25  ;;  %v294_v54 = vrot.slane %v179_v52, %v810_v2  ;;  %v298_v55 = vrot.slane %v179_v52, %v812_v3 }
  0x52   : > { %v216_v36 = vadd.f32 %v215_v30, %v213_v24  ;;  %v258_v39 = vadd.f32 %v255_v33, %v254_v32  ;;  %v302_v56 = vrot.slane %v179_v52, %v814_v4  ;;  %v306_v57 = vrot.slane %v179_v52, %v816_v5  ;;  %p599_p3 = pnand %p598_p0, %p592_p10 }
  0x53   : > { %v225_v40 = vadd.f32 %v224_v34, %v222_v29  ;;  %v269_v60 = vrot.slane %v177_v53, %v810_v2  ;;  %v273_v61 = vrot.slane %v177_v53, %v812_v3  ;;  %v277_v62 = vrot.slane %v177_v53, %v814_v4 }
  0x54   : > { %v217_v41 = vadd.f32 %v216_v36, %v214_v26  ;;  %v259_v42 = vadd.f32 %v258_v39, %v256_v35  ;;  %v281_v63 = vrot.slane %v177_v53, %v816_v5  ;;  %v328_v12 = vrot.slane %v185_v59, %v810_v2 }
  0x55   : > { %v226_v43 = vadd.f32 %v225_v40, %v223_v37  ;;  %v332_v19 = vrot.slane %v185_v59, %v812_v3  ;;  %v336_v20 = vrot.slane %v185_v59, %v814_v4  ;;  %v340_v21 = vrot.slane %v185_v59, %v816_v5 }
  0x56   : > { %218 = vadd.xlane.f32.xlu0 %v217_v41  ;;  %v260_v44 = vadd.f32 %v259_v42, %v257_v38 }
  0x58   : > { %261 = vadd.xlane.f32.xlu1 %v260_v44 }
  0x5a   : > { %227 = vadd.xlane.f32.xlu0 %v226_v43 }
  0xdf   : > { %v219_v45 = vpop.xlane.xlu0 %218 }
  0xe0   : > { %v229_v47 = vmul.f32 %v219_v45, %v219_v45 }
  0xe1   : > { %v262_v46 = vpop.xlane.xlu1 %261 }
  0xe2   : > { %v263_v48 = vadd.f32 1e-05, %v262_v46 }
  0xe3   : > { %v228_v49 = vpop.xlane.xlu0 %227 }
  0xe4   : > { %v230_v50 = vsub.f32 %v228_v49, %v229_v47  ;;  %531 = vrsqrt.f32 %v263_v48 }
  0xe6   : > { %v231_v51 = vadd.f32 1e-05, %v230_v50 }
  0xe8   : > { %533 = vrsqrt.f32 %v231_v51 }
  0xf1   : > { %v532_v58 = vpop.eup %531 }
  0xf2   : > { %v311_v0 = vmul.f32 %v532_v58, %v294_v54  ;;  %v312_v1 = vmul.f32 %v532_v58, %v298_v55  ;;  %v313_v9 = vmul.f32 %v532_v58, %v302_v56  ;;  %v314_v10 = vmul.f32 %v532_v58, %v306_v57 }
  0xf5   : > { %v534_v11 = vpop.eup %533 }
  0xf6   : > { %v286_v14 = vmul.f32 %v534_v11, %v269_v60  ;;  %v287_v15 = vmul.f32 %v534_v11, %v273_v61  ;;  %v288_v16 = vmul.f32 %v534_v11, %v277_v62  ;;  %v289_v17 = vmul.f32 %v534_v11, %v281_v63 }
  0xf7   : > { %v319_v18 = vmul.f32 %v534_v11, %v219_v45 }
  0xf8   : > { %v315_v22 = vadd.f32 %v311_v0, %v286_v14  ;;  %v316_v23 = vadd.f32 %v312_v1, %v287_v15  ;;  %v317_v24 = vadd.f32 %v313_v9, %v288_v16  ;;  %v318_v25 = vadd.f32 %v314_v10, %v289_v17 }
  0xf9   : > { %v320_v26 = vmul.f32 %v319_v18, %v269_v60  ;;  %v321_v27 = vmul.f32 %v319_v18, %v273_v61  ;;  %v322_v2 = vmul.f32 %v319_v18, %v277_v62  ;;  %v323_v28 = vmul.f32 %v319_v18, %v281_v63 }
  0xfa   : > { %v349_v29 = vmul.f32 %v315_v22, %v818_v6  ;;  %v350_v30 = vmul.f32 %v316_v23, %v820_v7  ;;  %v351_v31 = vmul.f32 %v317_v24, %v822_v8  ;;  %v352_v3 = vmul.f32 %v318_v25, %v830_v13 }
  0xfb   : > { %v345_v4 = vsub.f32 %v328_v12, %v320_v26  ;;  %v346_v5 = vsub.f32 %v332_v19, %v321_v27  ;;  %v347_v32 = vsub.f32 %v336_v20, %v322_v2  ;;  %v348_v33 = vsub.f32 %v340_v21, %v323_v28 }
  0xfd   : > { %v353_v34 = vadd.f32 %v349_v29, %v345_v4  ;;  %v354_v35 = vadd.f32 %v350_v30, %v346_v5  ;;  %v355_v36 = vadd.f32 %v351_v31, %v347_v32  ;;  %v356_v6 = vadd.f32 %v352_v3, %v348_v33 }
  0xff   : > { %357 = vst [vmem:[%s172_s17] sm:$0xff] %v353_v34  ;;  %358 = vst [vmem:[%s172_s17 + $0x8] sm:$0xff] %v354_v35 }
 0x100   : > { %359 = vst [vmem:[%s172_s17 + $0x10] sm:$0xff] %v355_v36  ;;  %360 = vst [vmem:[%s172_s17 + $0x18] sm:$0xff] %v356_v6 }
 0x101   : > { %602 = shalt.err (!%p599_p3)
}
 0x102   : > { %s603_s26 = scalar_lea.hbm %s868_s19, 512  ;;  %s607_s3 = scalar_lea.hbm %s913_s2, 1024 }
 0x103   : > { %p604_p12 = scmp.ne.s32.totalorder %s868_s19, %s603_s26  ;;  %p608_p4 = scmp.lt.s32.totalorder %s868_s19, %s913_s2 }
 0x104   : > { %p609_p6 = scmp.lt.s32.totalorder %s607_s3, %s603_s26 }
 0x105   : > { %p605_p5 = pnand %p604_p12, %p930_p11 }
 0x106   : > { %p610_p8 = por %p609_p6, %p608_p4 }
 0x107   : > { %p606_p7 = pneg %p605_p5 }
 0x109   : > { %p611_p9 = pnand %p610_p8, %p606_p7 }
 0x10b   : > { %614 = shalt.err (!%p611_p9)
}
 0x10c   : > { %480 = dma.vmem_to_hbm [thread:$0]  (%p930_p11), %s870_s7, 512, %s868_s19, %s362_s13  }
 0x10d PF: > { %s388_s6 = sand.u32 1, %s645_s9   ;;  %p931_p13 = scmp.ne.s32.totalorder %s919_s16, 0 }
 0x10e   : > { %p932_p10 = scmp.ge.s32.totalorder %s657_s12, 2  ;;  %s389_s8 = scalar_lea.sflag [#allocation4], %s388_s6 }
 0x110   : > { %p491_p1 = pnand %p932_p10, %p931_p13 }
 0x112   : > { %p492_p2 = pneg %p491_p1 }
 0x114   : > { %640 = dma.done.wait (%p492_p2), %s389_s8, 512  }
 0x115   : > { %642 = vsyncadd (%p492_p2), %s389_s8, 4294966784  ;;  %p16_p0 = scmp.ge.s32.totalorder %s725_s20, 4   ;;  %s933_s9 = smov %s649_s10 }
 0x116   : > { %s934_s10 = smov %s653_s11  ;;  %s935_s11 = smov %s752_s28 }
 0x117   : > { %s936_s12 = smov %s725_s20  ;;  %18 = sbr.rel (!%p16_p0) target bundleno = 6 (0x6), region = 81 }
 0x11c   :  { %394 = vsyncpa [#allocation3], 1 }
 0x11d   :  { %396 = vsyncpa [#allocation3 + $0x1], 1 }
 0x11e   :  { %397 = vsyncpa [#allocation6], 1 }
 0x11f   :  { %398 = vsyncpa [#allocation4], 1 }
 0x120   :  { %400 = vsyncpa [#allocation4 + $0x1], 1 }

</bundles_post_ra>
